<compile_context>
chip_gen: v5e
topology: v5e:2x2
jax: 0.10.0
libtpu: 0.0.40
codegen_flags: <defaults>
</compile_context>

<pallas_src>
from functools import partial

import jax
import jax.numpy as jnp
from jax import lax
from jax.experimental import pallas as pl
from jax.experimental.pallas import tpu as pltpu


def _gram_kernel(proj_ref, x_ref, out_ref, acc_ref, *, inv_scale, hw, tk,
                 k_inner, needs_mask):
    # proj_ref: (nb, n_axis, ch)          VMEM (x dtype)
    # x_ref:    (nb, ch, tk)              VMEM (native x dtype)
    # out_ref:  (1, nb, n_axis, n_axis)   VMEM f32 (partial gram, scaled)
    # acc_ref:  (nb, n_axis, n_axis)      VMEM f32, resident across k
    k = pl.program_id(2)

    @pl.when(k == 0)
    def _():
        acc_ref[...] = jnp.zeros_like(acc_ref)

    proj = proj_ref[...]
    x = x_ref[...]

    # p = proj @ x per batch, f32 accumulation on the MXU.
    p = jnp.einsum('bnc,bck->bnk', proj, x,
                   preferred_element_type=jnp.float32)

    if needs_mask:
        # Zero lanes past the true spatial extent (ragged last tile and any
        # logical tiles created by the 2-way reduction split) BEFORE the
        # gram accumulate.
        s = pl.program_id(1)
        col0 = (s * k_inner + k) * tk
        col = lax.broadcasted_iota(jnp.int32, (1, 1, tk), 2) + col0
        p = jnp.where(col < hw, p, jnp.float32(0.0))

    # Partial gram: contract the spatial-tile dim of both operands directly
    # (no explicit transpose materialized).
    acc_ref[...] += jnp.einsum('bnk,bmk->bnm', p, p,
                               preferred_element_type=jnp.float32)

    @pl.when(k == pl.num_programs(2) - 1)
    def _():
        out_ref[0] = acc_ref[...] * jnp.float32(inv_scale)


def _vmem_budget_and_limit():
    """(bytes usable for pipelined tiles, vmem_limit_bytes) — generation aware."""
    cap = 128 << 20  # v5e/v6e physical VMEM; safe upper fallback
    try:
        cap = int(pltpu.get_tpu_info().vmem_capacity_bytes)
    except Exception:
        pass
    budget = (cap * 11) // 20      # ~55% for our tiles (rest: internals/spills)
    limit = (cap * 3) // 4         # ~48 MiB on v7x (64 MiB), ~96 MiB on v5e/v6e
    return budget, limit


def _choose_batch_block(b_size, ch):
    """Pack nb batches per grid step when ch is small (fewer, bigger steps)."""
    if ch >= 128:
        return 1
    nb = 1
    for cand in range(1, min(b_size, 16) + 1):
        if b_size % cand == 0 and cand * ch <= 256:
            nb = cand
    return nb


def _choose_hw_tile(hw, nb, ch, n_axis, x_itemsize, budget):
    """Largest lane-aligned spatial tile whose working set fits the budget."""
    fixed = (2 * nb * n_axis * ch * x_itemsize      # double-buffered proj
             + 3 * nb * n_axis * n_axis * 4         # out (x2) + acc
             + (256 << 10))                         # slack for internals
    per_lane = (2 * nb * ch * x_itemsize            # double-buffered x tile
                + 2 * nb * n_axis * 4)              # f32 p intermediate (+slack)
    tk = max(128, ((budget - fixed) // per_lane // 128) * 128)
    if tk >= hw:
        return hw, 1                                # single full-extent tile
    return tk, pl.cdiv(hw, tk)


def gram_matrix_loss(x, proj, target):
    """MSE( gram_matrix(x), target ) — matches GramMatrixLossRandomAxis.forward."""
    b_size, ch, h, w = x.shape
    n_axis = proj.shape[1]
    hw = h * w

    x_flat = x.reshape(b_size, ch, hw)              # native dtype, no pad/copy
    budget, vmem_limit = _vmem_budget_and_limit()
    nb = _choose_batch_block(b_size, ch)
    tk, num_k = _choose_hw_tile(hw, nb, ch, n_axis, x_flat.dtype.itemsize,
                                budget)
    b_grid = b_size // nb

    # Optional 2-way split of the spatial reduction so v7x's 2 TensorCores are
    # both busy when the batch grid alone can't balance them.
    n_split = 2 if (b_grid % 2 == 1 and num_k >= 2) else 1
    k_inner = pl.cdiv(num_k, n_split)
    clamp_k = (n_split * k_inner != num_k)
    needs_mask = (num_k * tk != hw) or clamp_k
    inv_scale = 1.0 / float(hw * n_axis)            # uses the true (unpadded) hw

    def x_index_map(bi, s, k):
        kk = s * k_inner + k
        if clamp_k:
            # Logical tiles past the end re-read the last real tile; the
            # in-kernel mask zeroes their contribution.
            kk = jnp.minimum(kk, num_k - 1)
        return (bi, 0, kk)

    kernel = partial(_gram_kernel, inv_scale=inv_scale, hw=hw, tk=tk,
                     k_inner=k_inner, needs_mask=needs_mask)

    partial_grams = pl.pallas_call(
        kernel,
        out_shape=jax.ShapeDtypeStruct((n_split, b_size, n_axis, n_axis),
                                       jnp.float32),
        grid_spec=pltpu.PrefetchScalarGridSpec(
            num_scalar_prefetch=0,
            grid=(b_grid, n_split, k_inner),
            in_specs=[
                pl.BlockSpec((nb, n_axis, ch), lambda bi, s, k: (bi, 0, 0)),
                pl.BlockSpec((nb, ch, tk), x_index_map),
            ],
            out_specs=pl.BlockSpec((1, nb, n_axis, n_axis),
                                   lambda bi, s, k: (s, bi, 0, 0)),
            scratch_shapes=[pltpu.VMEM((nb, n_axis, n_axis), jnp.float32)],
        ),
        compiler_params=pltpu.CompilerParams(
            dimension_semantics=("parallel", "parallel", "arbitrary"),
            vmem_limit_bytes=int(vmem_limit)),
    )(proj.astype(x.dtype), x_flat)

    gram = jnp.sum(partial_grams, axis=0)           # (b, n_axis, n_axis), scaled
    return jnp.mean((gram - target.astype(jnp.float32)) ** 2)


# ----- plain-JAX glue: parameter init (proj) and target gram (init-time) -----

def gram_matrix_ref(y, proj):
    b, ch, h, w = y.shape
    n_axis = proj.shape[1]
    yf = y.reshape(b, ch, h * w)
    p = jnp.einsum('bnc,bcl->bnl', proj, yf)
    return jnp.einsum('bnl,bml->bnm', p, p) / jnp.float32(h * w * n_axis)


def make_proj(key, b_size, ch, n_axis):
    # Replicates the PyTorch init: for each batch, pick n_axis random channel
    # indices and set those entries to a single random sign (+1 or -1).
    proj = jnp.zeros((b_size, n_axis, ch), jnp.float32)
    for bi in range(b_size):
        key, k_idx, k_sign = jax.random.split(key, 3)
        mask = (jax.random.uniform(k_idx, (n_axis,)) * ch).astype(jnp.int32)
        sign = jnp.where(jax.random.uniform(k_sign, ()) < 0.5,
                         jnp.float32(1.0), jnp.float32(-1.0))
        proj = proj.at[bi, jnp.arange(n_axis), mask].set(sign)
    return proj


if __name__ == "__main__":
    key = jax.random.PRNGKey(0)
    k_tgt, k_in, k_proj = jax.random.split(key, 3)

    b_size, ch, h, w = 2, 4, 16, 16
    n_axis_frac = 1.0
    n_axis = max(1, int(n_axis_frac * ch))

    target_feature = jax.random.normal(k_tgt, (b_size, ch, h, w), jnp.float32)
    x = jax.random.normal(k_in, (b_size, ch, h, w), jnp.float32)

    # __init__ equivalent: deterministic proj + precomputed target gram.
    proj = make_proj(k_proj, b_size, ch, n_axis)
    target = gram_matrix_ref(target_feature, proj)

    # Forward pass via the Pallas kernel.
    loss = gram_matrix_loss(x, proj, target)
    loss = jax.block_until_ready(loss)

    # Correctness check against a pure-JAX reference of the forward pass.
    ref_loss = jnp.mean((gram_matrix_ref(x, proj) - target) ** 2)
    assert jnp.allclose(loss, ref_loss, rtol=1e-4, atol=1e-5), (loss, ref_loss)

    print("KERNEL_OK")
</pallas_src>

<mosaic_0001>
module attributes {stable_mosaic.version = 11 : i64} {
  func.func @_gram_kernel(%arg0: i32, %arg1: i32, %arg2: i32, %arg3: memref<2x4x4xf32, #tpu.memory_space<vmem>>, %arg4: memref<2x4x256xf32, #tpu.memory_space<vmem>>, %arg5: memref<1x2x4x4xf32, #tpu.memory_space<vmem>>, %arg6: memref<2x4x4xf32, #tpu.memory_space<vmem>>) attributes {dimension_semantics = [#tpu.dimension_semantics<parallel>, #tpu.dimension_semantics<parallel>, #tpu.dimension_semantics<arbitrary>], iteration_bounds = array<i64: 1, 1, 1>, scalar_prefetch = 0 : i64, scratch_operands = 1 : i64, tpu.core_type = #tpu.core_type<tc>, window_params = [{transform_indices = @transform_0, window_bounds = array<i64: 2, 4, 4>}, {transform_indices = @transform_1, window_bounds = array<i64: 2, 4, 256>}, {transform_indices = @transform_2, window_bounds = array<i64: 1, 2, 4, 4>}]} {
    %c0_i32 = arith.constant 0 : i32
    %0 = arith.cmpi eq, %arg2, %c0_i32 : i32
    %1 = arith.extui %0 : i1 to i32
    %c0_i32_0 = arith.constant 0 : i32
    %2 = arith.cmpi ne, %1, %c0_i32_0 : i32
    scf.if %2 {
      %cst_15 = arith.constant 0.000000e+00 : f32
      %13 = vector.broadcast %cst_15 : f32 to vector<2x4x4xf32>
      %c0_16 = arith.constant 0 : index
      %c0_17 = arith.constant 0 : index
      %c0_18 = arith.constant 0 : index
      %14 = vector.load %arg6[%c0_16, %c0_17, %c0_18] : memref<2x4x4xf32, #tpu.memory_space<vmem>>, vector<2x4x4xf32>
      tpu.vector_store %arg6[%c0_16, %c0_17, %c0_18], %13 {strides = array<i32>} : memref<2x4x4xf32, #tpu.memory_space<vmem>>, vector<2x4x4xf32>,
    } else {
    }
    %c0 = arith.constant 0 : index
    %c0_1 = arith.constant 0 : index
    %c0_2 = arith.constant 0 : index
    %3 = vector.load %arg3[%c0, %c0_1, %c0_2] : memref<2x4x4xf32, #tpu.memory_space<vmem>>, vector<2x4x4xf32>
    %c0_3 = arith.constant 0 : index
    %c0_4 = arith.constant 0 : index
    %c0_5 = arith.constant 0 : index
    %4 = vector.load %arg4[%c0_3, %c0_4, %c0_5] : memref<2x4x256xf32, #tpu.memory_space<vmem>>, vector<2x4x256xf32>
    "tpu.trace_start"() <{level = 10 : i32, message = "bnc,bck->bnk"}> : () -> ()
    %cst = arith.constant dense<0.000000e+00> : vector<2x4x256xf32>
    %5 = tpu.matmul %3, %4, %cst {dimension_numbers = #tpu.dot_dimension_numbers<[2], [1], [1], [2], [0, 0, 0, 1, 1, 2], [0], [0]>} : vector<2x4x4xf32>, vector<2x4x256xf32>, vector<2x4x256xf32> -> vector<2x4x256xf32>
    "tpu.trace_stop"() : () -> ()
    %c0_6 = arith.constant 0 : index
    %c0_7 = arith.constant 0 : index
    %c0_8 = arith.constant 0 : index
    %6 = vector.load %arg6[%c0_6, %c0_7, %c0_8] : memref<2x4x4xf32, #tpu.memory_space<vmem>>, vector<2x4x4xf32>
    "tpu.trace_start"() <{level = 10 : i32, message = "bnk,bmk->bnm"}> : () -> ()
    %cst_9 = arith.constant dense<0.000000e+00> : vector<2x4x4xf32>
    %7 = tpu.matmul %5, %5, %cst_9 {dimension_numbers = #tpu.dot_dimension_numbers<[2], [2], [1], [1], [0, 0, 0, 1, 1, 1], [0], [0]>} : vector<2x4x256xf32>, vector<2x4x256xf32>, vector<2x4x4xf32> -> vector<2x4x4xf32>
    "tpu.trace_stop"() : () -> ()
    %8 = arith.addf %6, %7 : vector<2x4x4xf32>
    %c0_10 = arith.constant 0 : index
    %c0_11 = arith.constant 0 : index
    %c0_12 = arith.constant 0 : index
    %9 = vector.load %arg6[%c0_10, %c0_11, %c0_12] : memref<2x4x4xf32, #tpu.memory_space<vmem>>, vector<2x4x4xf32>
    tpu.vector_store %arg6[%c0_10, %c0_11, %c0_12], %8 {strides = array<i32>} : memref<2x4x4xf32, #tpu.memory_space<vmem>>, vector<2x4x4xf32>,
    %c0_i32_13 = arith.constant 0 : i32
    %10 = arith.cmpi eq, %arg2, %c0_i32_13 : i32
    %11 = arith.extui %10 : i1 to i32
    %c0_i32_14 = arith.constant 0 : i32
    %12 = arith.cmpi ne, %11, %c0_i32_14 : i32
    scf.if %12 {
      %c0_15 = arith.constant 0 : index
      %c0_16 = arith.constant 0 : index
      %c0_17 = arith.constant 0 : index
      %13 = vector.load %arg6[%c0_15, %c0_16, %c0_17] : memref<2x4x4xf32, #tpu.memory_space<vmem>>, vector<2x4x4xf32>
      %cst_18 = arith.constant 9.765625E-4 : f32
      %14 = vector.broadcast %cst_18 : f32 to vector<2x4x4xf32>
      %15 = arith.mulf %13, %14 : vector<2x4x4xf32>
      %c0_19 = arith.constant 0 : index
      %c0_20 = arith.constant 0 : index
      %c0_21 = arith.constant 0 : index
      %c0_22 = arith.constant 0 : index
      %16 = vector.load %arg5[%c0_19, %c0_20, %c0_21, %c0_22] : memref<1x2x4x4xf32, #tpu.memory_space<vmem>>, vector<1x2x4x4xf32>
      %17 = vector.shape_cast %16 : vector<1x2x4x4xf32> to vector<2x4x4xf32>
      %18 = vector.shape_cast %15 : vector<2x4x4xf32> to vector<1x2x4x4xf32>
      tpu.vector_store %arg5[%c0_19, %c0_20, %c0_21, %c0_22], %18 {strides = array<i32>} : memref<1x2x4x4xf32, #tpu.memory_space<vmem>>, vector<1x2x4x4xf32>,
    } else {
    }
    return
  }
  func.func @transform_0(%arg0: i32, %arg1: i32, %arg2: i32) -> (i32, i32, i32) {
    %c0_i32 = arith.constant 0 : i32
    %c0_i32_0 = arith.constant 0 : i32
    %c0_i32_1 = arith.constant 0 : i32
    return %arg0, %c0_i32, %c0_i32_0 : i32, i32, i32
  }
  func.func @transform_1(%arg0: i32, %arg1: i32, %arg2: i32) -> (i32, i32, i32) {
    %c1_i32 = arith.constant 1 : i32
    %0 = arith.muli %arg1, %c1_i32 : i32
    %1 = arith.addi %0, %arg2 : i32
    %c0_i32 = arith.constant 0 : i32
    %c0_i32_0 = arith.constant 0 : i32
    return %arg0, %c0_i32, %1 : i32, i32, i32
  }
  func.func @transform_2(%arg0: i32, %arg1: i32, %arg2: i32) -> (i32, i32, i32, i32) {
    %c0_i32 = arith.constant 0 : i32
    %c0_i32_0 = arith.constant 0 : i32
    %c0_i32_1 = arith.constant 0 : i32
    return %arg1, %arg0, %c0_i32, %c0_i32_0 : i32, i32, i32, i32
  }
}

</mosaic_0001>

<bundles_post_ra>
// kernel: tpu_custom_call.1
= control target key start
LH: loop header
LB: loop body
LE: loop exit
PB: predicated region body
PF: predicated region fallthrough
CT: control target
= control target key end

     0   :  { %7 = vsyncpa [#allocation4], 0  ;;  %s419_s0 = inlined_call_operand.hbm [shape: f32[2,4,4], index: 0, kind: input, shape index: {}]   ;;  %s420_s1 = inlined_call_operand.hbm [shape: f32[2,4,256], index: 1, kind: input, shape index: {}]   ;;  %s421_s2 = inlined_call_operand.hbm [shape: f32[1,2,4,4], index: 2, kind: output, shape index: {}]  }
   0x1   :  { %8 = vsyncpa [#allocation7], 0 }
   0x2   :  { %9 = vsyncpa [#allocation5], 0  ;;  %s14_s11 = sshll.u32 %s419_s0, 4  ;;  %s375_s12 = smov [#allocation3]   ;;  %s15_s11 = int_to_ptr.hbm [resolvable:$true] %s14_s11 }
   0x3   :  { %s16_s13 = sshll.u32 %s375_s12, 4  ;;  %s31_s16 = sshll.u32 %s420_s1, 4  ;;  %s17_s13 = int_to_ptr.vmem [resolvable:$true] %s16_s13  ;;  %s32_s16 = int_to_ptr.hbm [resolvable:$true] %s31_s16 }
   0x4   :  { %s376_s17 = smov 64   ;;  %s377_s18 = smov 4  }
   0x5   :  { %22 = dma.hbm_to_vmem [thread:$0]  %s15_s11, 128, %s17_s13, [#allocation4], %s376_s17, %s376_s17, %s377_s18  }
   0x6   :  { %s378_s19 = smov [#allocation6]   ;;  %s379_s21 = smov 128  }
   0x7   :  { %s33_s20 = sshll.u32 %s378_s19, 4  ;;  %s380_s0 = smov 8   ;;  %s34_s20 = int_to_ptr.vmem [resolvable:$true] %s33_s20 }
   0x8   :  { %39 = dma.hbm_to_vmem [thread:$0]  %s32_s16, 256, %s34_s20, [#allocation7], %s379_s21, %s379_s21, %s380_s0  }
   0x9   :  { %369 = dma.done.wait [#allocation4], 128  }
   0xa   :  { %370 = vsyncadd [#allocation4], 4294967168 }
   0xb   :  { %371 = dma.done.wait [#allocation7], 256  }
   0xc   :  { %372 = vsyncadd [#allocation7], 4294967040  ;;  %v59_v0 = vld [vmem:[#allocation6] sm:$0xff]  ;;  %v60_v1 = vld [vmem:[#allocation6 + $0x8] sm:$0xff]  ;;  %vm69_vm0 = vcmask 1043456   ;;  %vm65_vm1 = vcmask 31744  }
   0xd   :  { %62 = vst [vmem:[#allocation1] ss:$2 sm:$0xff] %v59_v0  ;;  %v57_v2 = vld [vmem:[#allocation3] sm:$0xf]  ;;  %v58_v5 = vld [vmem:[#allocation3 + $0x4] sm:$0xf] }
   0xe   :  { %vm54_vm2 = vcmask 27648   ;;  %v381_v12 = vmov 0.0   ;;  %s382_s1 = smov [#allocation8]   ;;  %s267_s25 = sshll.u32 %s421_s2, 4  ;;  %s268_s25 = int_to_ptr.hbm [resolvable:$true] %s267_s25 }
   0xf   :  { %55 = vst.msk [vmem:[#allocation2] sm:$0xf] %vm54_vm2, %v381_v12  ;;  %s265_s22 = sshll.u32 %s382_s1, 4  ;;  %s266_s22 = int_to_ptr.vmem [resolvable:$true] %s265_s22 }
  0x10   :  { %56 = vst.msk [vmem:[#allocation2 + $0x4] sm:$0xf] %vm54_vm2, %v381_v12 }
  0x14   :  { %v63_v3 = vld.sshfl [vmem:[#allocation1] sm:$0xff pattern:$0x75316420]  ;;  %v64_v4 = vld.sshfl [vmem:[#allocation1 + $0x8] sm:$0xff pattern:$0x75316420] }
  0x15   :  { %115 = vst [vmem:[#allocation1] ss:$2 sm:$0xff] %v60_v1  ;;  %281 = vmatpush.msk.msra.mxu0 %vm69_vm0, %v63_v3  ;;  %283 = vmatpush.msk.msra.mxu1 %vm69_vm0, %v64_v4 }
  0x16   :  { %282 = vmatmul.msk.f32.vlgmr.msra.gmra.mxu0 %vm65_vm1, %v57_v2  ;;  %284 = vmatmul.msk.f32.vlgmr.msra.gmra.mxu1 %vm65_vm1, %v57_v2  ;;  %v165_v14 = vld [vmem:[#allocation2] sm:$0xf] }
  0x17   :  { %v166_v21 = vld [vmem:[#allocation2 + $0x4] sm:$0xf] }
  0x1c   :  { %v116_v6 = vld.sshfl [vmem:[#allocation1] sm:$0xff pattern:$0x75316420]  ;;  %v117_v7 = vld.sshfl [vmem:[#allocation1 + $0x8] sm:$0xff pattern:$0x75316420] }
  0x1d   :  { %285 = vmatpush.msk.msra.mxu2 %vm69_vm0, %v116_v6  ;;  %287 = vmatpush.msk.msra.mxu3 %vm69_vm0, %v117_v7 }
  0x1e   :  { %286 = vmatmul.msk.f32.vlgmr.msra.gmra.mxu2 %vm65_vm1, %v58_v5  ;;  %288 = vmatmul.msk.f32.vlgmr.msra.gmra.mxu3 %vm65_vm1, %v58_v5 }
  0x93   :  { %v91_v8 = vpop.f32.mrf.mxu0  ;;  %v111_v9 = vpop.f32.mrf.mxu1 }
  0x94   :  { %182 = vmatpush.xpose.msrb.mxu0 %v91_v8  ;;  %202 = vmatpush.xpose.msrb.mxu1 %v111_v9 }
  0x97   :  { %183 = vmatmul.f32.vlgmr.msrb.gmra.mxu0 %v91_v8  ;;  %203 = vmatmul.f32.vlgmr.msrb.gmra.mxu1 %v111_v9 }
  0xa1   :  { %v142_v10 = vpop.f32.mrf.mxu2  ;;  %v162_v11 = vpop.f32.mrf.mxu3 }
  0xa2   :  { %222 = vmatpush.xpose.msrb.mxu2 %v142_v10  ;;  %242 = vmatpush.xpose.msrb.mxu3 %v162_v11 }
  0xa5   :  { %223 = vmatmul.f32.vlgmr.msrb.gmra.mxu2 %v142_v10  ;;  %243 = vmatmul.f32.vlgmr.msrb.gmra.mxu3 %v162_v11 }
 0x114   :  { %v184_v13 = vpop.f32.mrf.mxu0  ;;  %v204_v15 = vpop.f32.mrf.mxu1 }
 0x115   :  { %v205_v16 = vadd.f32 %v204_v15, %v184_v13 }
 0x117   :  { %v247_v17 = vadd.f32 %v205_v16, %v165_v14 }
 0x119   :  { %250 = vst.msk [vmem:[#allocation2] sm:$0xf] %vm54_vm2, %v247_v17 }
 0x120   :  { %v255_v18 = vld [vmem:[#allocation2] sm:$0xf] }
 0x121   :  { %v257_v19 = vmul.f32 0.0009765625, %v255_v18 }
 0x123   :  { %259 = vst.msk [vmem:[#allocation8] sm:$0xf] %vm54_vm2, %v257_v19 }
 0x128   :  { %v224_v20 = vpop.f32.mrf.mxu2  ;;  %v244_v22 = vpop.f32.mrf.mxu3 }
 0x129   :  { %v245_v23 = vadd.f32 %v244_v22, %v224_v20 }
 0x12b   :  { %v248_v24 = vadd.f32 %v245_v23, %v166_v21 }
 0x12d   :  { %251 = vst.msk [vmem:[#allocation2 + $0x4] sm:$0xf] %vm54_vm2, %v248_v24 }
 0x134   :  { %v256_v25 = vld [vmem:[#allocation2 + $0x4] sm:$0xf] }
 0x135   :  { %v258_v26 = vmul.f32 0.0009765625, %v256_v25 }
 0x137   :  { %260 = vst.msk [vmem:[#allocation8 + $0x4] sm:$0xf] %vm54_vm2, %v258_v26 }
 0x138   :  { %273 = dma.vmem_to_hbm [thread:$0]  %s266_s22, 128, %s268_s25, [#allocation5], %s376_s17, %s376_s17, %s377_s18  }
 0x139   :  { %373 = dma.done.wait [#allocation5], 128  }
 0x13a   :  { %374 = vsyncadd [#allocation5], 4294967168 }
 0x13b   :  { %278 = vsyncpa [#allocation4], 1 }
 0x13c   :  { %279 = vsyncpa [#allocation7], 1 }
 0x13d   :  { %280 = vsyncpa [#allocation5], 1 }

</bundles_post_ra>
